<compile_context>
chip_gen: v5e
topology: v5e:2x2
jax: 0.10.0
libtpu: 0.0.40
codegen_flags: <defaults>
</compile_context>

<pallas_src>
import functools
import math

import jax
import jax.numpy as jnp
from jax.experimental import pallas as pl
from jax.experimental.pallas import tpu as pltpu

SCALE = 26.0
MARGIN = 0.5
COS_M = math.cos(MARGIN)
SIN_M = math.sin(MARGIN)


def arcface_loss_kernel(logits_ref, labels_ref, loss_ref, l_sc, t_sc,
                        *, num_classes):
    k = pl.program_id(1)

    @pl.when(k == 0)
    def _():
        l_sc[...] = jnp.zeros_like(l_sc)
        t_sc[...] = jnp.zeros_like(t_sc)

    x = logits_ref[...].astype(jnp.float32)       # (TB, TC) cosine logits
    lab = labels_ref[...]                         # (TB, 1) int32 labels
    TB, TC = x.shape

    # One-hot via static iota vs. shifted label (no full-tile int add).
    lab_shift = lab - k * TC                                            # (TB,1)
    col = jax.lax.broadcasted_iota(jnp.int32, (TB, TC), 1)              # static
    one_hot = col == lab_shift                    # at most one True per row
    in_tile = (lab_shift >= 0) & (lab_shift < TC)                       # (TB,1)

    # Target cosine for rows whose label lands in this class tile (else 0;
    # cos_shift then evaluates to -sin(m) but is never selected/accumulated).
    x_t = jnp.sum(jnp.where(one_hot, x, 0.0), axis=-1, keepdims=True)   # (TB,1)
    # cos(arccos(x)+m) identity, evaluated on the (TB,1) column only.
    cos_shift = x_t * COS_M - jnp.sqrt(jnp.maximum(1.0 - x_t * x_t, 0.0)) * SIN_M

    out = jnp.where(one_hot, cos_shift, x) * SCALE                      # (TB,TC)
    if num_classes % TC != 0:
        # Last class tile extends past C: mask padded lanes out of the softmax.
        # (Shifted compare against the static iota; harmless on earlier tiles.)
        out = jnp.where(col < (num_classes - k * TC), out, -jnp.inf)

    # Fixed-max streaming logsumexp: |out| <= SCALE since inputs are cosines,
    # so exp(out - SCALE) is in [e^-52, 1] -> safe in f32, no running max.
    l_sc[...] += jnp.sum(jnp.exp(out - SCALE), axis=-1, keepdims=True)
    # Target logit from the (TB,1) column; no second full-tile select/reduce.
    t_sc[...] += jnp.where(in_tile, SCALE * cos_shift, 0.0)

    @pl.when(k == pl.num_programs(1) - 1)
    def _():
        # Cross entropy per row: logsumexp(out) - out[label]
        loss_ref[...] = (SCALE + jnp.log(l_sc[...])) - t_sc[...]


def arcface_loss(logits, labels, *, tile_b=256, tile_c=8192):
    """logits: (B, C) cosines (f32 or bf16; upcast in-kernel); labels: (B,) ints.

    Returns the scalar ArcFace cross-entropy loss (mean over batch).
    """
    B, C = logits.shape
    labels2d = labels.astype(jnp.int32).reshape(B, 1)

    # Class tile: full C if it fits in one tile, else a 128-multiple stream tile.
    TC = C if C <= tile_c else tile_c

    # Batch tile: aim for >= 2 batch tiles (v7x megacore) when B is small;
    # otherwise use tile_b (multiple of 8). Pad B up to a tile multiple.
    if B <= tile_b:
        TB = max(8, ((pl.cdiv(B, 2) + 7) // 8) * 8)
    else:
        TB = tile_b
    Bp = pl.cdiv(B, TB) * TB
    if Bp != B:
        logits = jnp.pad(logits, ((0, Bp - B), (0, 0)))
        labels2d = jnp.pad(labels2d, ((0, Bp - B), (0, 0)))

    grid = (Bp // TB, pl.cdiv(C, TC))

    row_loss = pl.pallas_call(
        functools.partial(arcface_loss_kernel, num_classes=C),
        out_shape=jax.ShapeDtypeStruct((Bp, 1), jnp.float32),
        grid_spec=pltpu.PrefetchScalarGridSpec(
            num_scalar_prefetch=0,
            grid=grid,
            in_specs=[
                pl.BlockSpec((TB, TC), lambda i, k: (i, k)),
                pl.BlockSpec((TB, 1), lambda i, k: (i, 0)),   # resident over k
            ],
            out_specs=pl.BlockSpec((TB, 1), lambda i, k: (i, 0)),
            scratch_shapes=[
                pltpu.VMEM((TB, 1), jnp.float32),   # running exp-sum (m=SCALE)
                pltpu.VMEM((TB, 1), jnp.float32),   # target logit
            ],
        ),
        compiler_params=pltpu.CompilerParams(
            dimension_semantics=("parallel", "arbitrary"),
            vmem_limit_bytes=48 * 1024 * 1024,
        ),
    )(logits, labels2d)

    return jnp.mean(row_loss[:B, 0])


def arcface_loss_ref(logits, labels):
    """Pure-JAX reference mirroring the PyTorch module exactly."""
    C = logits.shape[1]
    one_hot = jax.nn.one_hot(labels, C, dtype=jnp.float32)
    theta = jnp.arccos(logits.astype(jnp.float32)) + MARGIN * one_hot
    out = jnp.cos(theta) * SCALE
    logp = jax.nn.log_softmax(out, axis=-1)
    return -jnp.mean(jnp.sum(one_hot * logp, axis=-1))


def _run_case(key, B, C, dtype=jnp.float32, **tile_kwargs):
    k1, k2 = jax.random.split(key)
    logits = jax.random.uniform(k1, (B, C), jnp.float32, minval=-0.95, maxval=0.95)
    labels = jax.random.randint(k2, (B,), 0, C, dtype=jnp.int32)
    loss = jax.block_until_ready(arcface_loss(logits.astype(dtype), labels,
                                              **tile_kwargs))
    ref = jax.block_until_ready(arcface_loss_ref(logits.astype(dtype), labels))
    assert jnp.isfinite(loss), f"non-finite loss for B={B}, C={C}"
    assert jnp.allclose(loss, ref, rtol=2e-3, atol=2e-3), (B, C, loss, ref)


if __name__ == "__main__":
    key = jax.random.PRNGKey(0)
    keys = jax.random.split(key, 4)
    # Small single-block case.
    _run_case(keys[0], B=8, C=256)
    # Multi-tile streaming case: (3 batch tiles) x (3 class tiles).
    _run_case(keys[1], B=24, C=384, tile_b=8, tile_c=128)
    # Ragged case: batch padded and last class tile masked (200 % 128 != 0),
    # plus the megacore-split batch-tile path (B=20 <= tile_b=256 -> TB=16).
    _run_case(keys[2], B=20, C=200, tile_c=128)
    # bf16-on-the-wire case (kernel upcasts internally).
    _run_case(keys[3], B=16, C=256, dtype=jnp.bfloat16, tile_c=128)
    print("KERNEL_OK")
</pallas_src>

<mosaic_0001>
module attributes {stable_mosaic.version = 11 : i64} {
  func.func @arcface_loss_kernel(%arg0: i32, %arg1: i32, %arg2: memref<8x256xf32, #tpu.memory_space<vmem>>, %arg3: memref<8x1xi32, #tpu.memory_space<vmem>>, %arg4: memref<8x1xf32, #tpu.memory_space<vmem>>, %arg5: memref<8x1xf32, #tpu.memory_space<vmem>>, %arg6: memref<8x1xf32, #tpu.memory_space<vmem>>) attributes {dimension_semantics = [#tpu.dimension_semantics<parallel>, #tpu.dimension_semantics<arbitrary>], iteration_bounds = array<i64: 1, 1>, scalar_prefetch = 0 : i64, scratch_operands = 2 : i64, tpu.core_type = #tpu.core_type<tc>, window_params = [{transform_indices = @transform_0, window_bounds = array<i64: 8, 256>}, {transform_indices = @transform_1, window_bounds = array<i64: 8, 1>}, {transform_indices = @transform_2, window_bounds = array<i64: 8, 1>}]} {
    %c0_i32 = arith.constant 0 : i32
    %0 = arith.cmpi eq, %arg1, %c0_i32 : i32
    %1 = arith.extui %0 : i1 to i32
    %c0_i32_0 = arith.constant 0 : i32
    %2 = arith.cmpi ne, %1, %c0_i32_0 : i32
    scf.if %2 {
      %cst_26 = arith.constant 0.000000e+00 : f32
      %54 = vector.broadcast %cst_26 : f32 to vector<8x1xf32>
      %c0_27 = arith.constant 0 : index
      %c0_28 = arith.constant 0 : index
      %55 = vector.load %arg5[%c0_27, %c0_28] : memref<8x1xf32, #tpu.memory_space<vmem>>, vector<8x1xf32>
      tpu.vector_store %arg5[%c0_27, %c0_28], %54 {strides = array<i32>} : memref<8x1xf32, #tpu.memory_space<vmem>>, vector<8x1xf32>,
      %cst_29 = arith.constant 0.000000e+00 : f32
      %56 = vector.broadcast %cst_29 : f32 to vector<8x1xf32>
      %c0_30 = arith.constant 0 : index
      %c0_31 = arith.constant 0 : index
      %57 = vector.load %arg6[%c0_30, %c0_31] : memref<8x1xf32, #tpu.memory_space<vmem>>, vector<8x1xf32>
      tpu.vector_store %arg6[%c0_30, %c0_31], %56 {strides = array<i32>} : memref<8x1xf32, #tpu.memory_space<vmem>>, vector<8x1xf32>,
    } else {
    }
    %c0 = arith.constant 0 : index
    %c0_1 = arith.constant 0 : index
    %3 = vector.load %arg2[%c0, %c0_1] : memref<8x256xf32, #tpu.memory_space<vmem>>, vector<8x256xf32>
    %c0_2 = arith.constant 0 : index
    %c0_3 = arith.constant 0 : index
    %4 = vector.load %arg3[%c0_2, %c0_3] : memref<8x1xi32, #tpu.memory_space<vmem>>, vector<8x1xi32>
    %c256_i32 = arith.constant 256 : i32
    %5 = arith.muli %arg1, %c256_i32 : i32
    %6 = vector.broadcast %5 : i32 to vector<8x1xi32>
    %7 = arith.subi %4, %6 : vector<8x1xi32>
    %8 = tpu.iota {dimensions = array<i32: 1>} : vector<8x256xi32>
    %9 = vector.broadcast %7 : vector<8x1xi32> to vector<8x256xi32>
    %10 = arith.cmpi eq, %8, %9 : vector<8x256xi32>
    %c0_i32_4 = arith.constant 0 : i32
    %11 = vector.broadcast %c0_i32_4 : i32 to vector<8x1xi32>
    %12 = arith.cmpi sge, %7, %11 : vector<8x1xi32>
    %c256_i32_5 = arith.constant 256 : i32
    %13 = vector.broadcast %c256_i32_5 : i32 to vector<8x1xi32>
    %14 = arith.cmpi slt, %7, %13 : vector<8x1xi32>
    %15 = arith.andi %12, %14 : vector<8x1xi1>
    %cst = arith.constant 0.000000e+00 : f32
    %16 = vector.broadcast %cst : f32 to vector<8x256xf32>
    %17 = arith.select %10, %3, %16 : vector<8x256xi1>, vector<8x256xf32>
    %cst_6 = arith.constant dense<0.000000e+00> : vector<8xf32>
    %18 = vector.multi_reduction <add>, %17, %cst_6 [1] : vector<8x256xf32> to vector<8xf32>
    %19 = vector.shape_cast %18 : vector<8xf32> to vector<8x1xf32>
    %cst_7 = arith.constant 0.87758255 : f32
    %20 = vector.broadcast %cst_7 : f32 to vector<8x1xf32>
    %21 = arith.mulf %19, %20 : vector<8x1xf32>
    %22 = arith.mulf %19, %19 : vector<8x1xf32>
    %cst_8 = arith.constant 1.000000e+00 : f32
    %23 = vector.broadcast %cst_8 : f32 to vector<8x1xf32>
    %24 = arith.subf %23, %22 : vector<8x1xf32>
    %cst_9 = arith.constant 0.000000e+00 : f32
    %25 = vector.broadcast %cst_9 : f32 to vector<8x1xf32>
    %26 = arith.maximumf %24, %25 : vector<8x1xf32>
    %27 = math.sqrt %26 : vector<8x1xf32>
    %cst_10 = arith.constant 0.47942555 : f32
    %28 = vector.broadcast %cst_10 : f32 to vector<8x1xf32>
    %29 = arith.mulf %27, %28 : vector<8x1xf32>
    %30 = arith.subf %21, %29 : vector<8x1xf32>
    %31 = vector.shape_cast %30 : vector<8x1xf32> to vector<8x1xf32>
    %32 = vector.broadcast %31 : vector<8x1xf32> to vector<8x256xf32>
    %33 = arith.select %10, %32, %3 : vector<8x256xi1>, vector<8x256xf32>
    %cst_11 = arith.constant 2.600000e+01 : f32
    %34 = vector.broadcast %cst_11 : f32 to vector<8x256xf32>
    %35 = arith.mulf %33, %34 : vector<8x256xf32>
    %c0_12 = arith.constant 0 : index
    %c0_13 = arith.constant 0 : index
    %36 = vector.load %arg5[%c0_12, %c0_13] : memref<8x1xf32, #tpu.memory_space<vmem>>, vector<8x1xf32>
    %cst_14 = arith.constant 2.600000e+01 : f32
    %37 = vector.broadcast %cst_14 : f32 to vector<8x256xf32>
    %38 = arith.subf %35, %37 : vector<8x256xf32>
    %39 = math.exp %38 : vector<8x256xf32>
    %cst_15 = arith.constant dense<0.000000e+00> : vector<8xf32>
    %40 = vector.multi_reduction <add>, %39, %cst_15 [1] : vector<8x256xf32> to vector<8xf32>
    %41 = vector.shape_cast %40 : vector<8xf32> to vector<8x1xf32>
    %42 = arith.addf %36, %41 : vector<8x1xf32>
    %c0_16 = arith.constant 0 : index
    %c0_17 = arith.constant 0 : index
    %43 = vector.load %arg5[%c0_16, %c0_17] : memref<8x1xf32, #tpu.memory_space<vmem>>, vector<8x1xf32>
    tpu.vector_store %arg5[%c0_16, %c0_17], %42 {strides = array<i32>} : memref<8x1xf32, #tpu.memory_space<vmem>>, vector<8x1xf32>,
    %c0_18 = arith.constant 0 : index
    %c0_19 = arith.constant 0 : index
    %44 = vector.load %arg6[%c0_18, %c0_19] : memref<8x1xf32, #tpu.memory_space<vmem>>, vector<8x1xf32>
    %cst_20 = arith.constant 2.600000e+01 : f32
    %45 = vector.broadcast %cst_20 : f32 to vector<8x1xf32>
    %46 = arith.mulf %45, %30 : vector<8x1xf32>
    %cst_21 = arith.constant 0.000000e+00 : f32
    %47 = vector.broadcast %cst_21 : f32 to vector<8x1xf32>
    %48 = arith.select %15, %46, %47 : vector<8x1xi1>, vector<8x1xf32>
    %49 = arith.addf %44, %48 : vector<8x1xf32>
    %c0_22 = arith.constant 0 : index
    %c0_23 = arith.constant 0 : index
    %50 = vector.load %arg6[%c0_22, %c0_23] : memref<8x1xf32, #tpu.memory_space<vmem>>, vector<8x1xf32>
    tpu.vector_store %arg6[%c0_22, %c0_23], %49 {strides = array<i32>} : memref<8x1xf32, #tpu.memory_space<vmem>>, vector<8x1xf32>,
    %c0_i32_24 = arith.constant 0 : i32
    %51 = arith.cmpi eq, %arg1, %c0_i32_24 : i32
    %52 = arith.extui %51 : i1 to i32
    %c0_i32_25 = arith.constant 0 : i32
    %53 = arith.cmpi ne, %52, %c0_i32_25 : i32
    scf.if %53 {
      %c0_26 = arith.constant 0 : index
      %c0_27 = arith.constant 0 : index
      %54 = vector.load %arg5[%c0_26, %c0_27] : memref<8x1xf32, #tpu.memory_space<vmem>>, vector<8x1xf32>
      %55 = math.log %54 : vector<8x1xf32>
      %cst_28 = arith.constant 2.600000e+01 : f32
      %56 = vector.broadcast %cst_28 : f32 to vector<8x1xf32>
      %57 = arith.addf %56, %55 : vector<8x1xf32>
      %c0_29 = arith.constant 0 : index
      %c0_30 = arith.constant 0 : index
      %58 = vector.load %arg6[%c0_29, %c0_30] : memref<8x1xf32, #tpu.memory_space<vmem>>, vector<8x1xf32>
      %59 = arith.subf %57, %58 : vector<8x1xf32>
      %c0_31 = arith.constant 0 : index
      %c0_32 = arith.constant 0 : index
      %60 = vector.load %arg4[%c0_31, %c0_32] : memref<8x1xf32, #tpu.memory_space<vmem>>, vector<8x1xf32>
      tpu.vector_store %arg4[%c0_31, %c0_32], %59 {strides = array<i32>} : memref<8x1xf32, #tpu.memory_space<vmem>>, vector<8x1xf32>,
    } else {
    }
    return
  }
  func.func @transform_0(%arg0: i32, %arg1: i32) -> (i32, i32) {
    %c0_i32 = arith.constant 0 : i32
    return %arg0, %arg1 : i32, i32
  }
  func.func @transform_1(%arg0: i32, %arg1: i32) -> (i32, i32) {
    %c0_i32 = arith.constant 0 : i32
    %c0_i32_0 = arith.constant 0 : i32
    return %arg0, %c0_i32 : i32, i32
  }
  func.func @transform_2(%arg0: i32, %arg1: i32) -> (i32, i32) {
    %c0_i32 = arith.constant 0 : i32
    %c0_i32_0 = arith.constant 0 : i32
    return %arg0, %c0_i32 : i32, i32
  }
}

</mosaic_0001>

<bundles_post_ra>
// kernel: tpu_custom_call.1
= control target key start
LH: loop header
LB: loop body
LE: loop exit
PB: predicated region body
PF: predicated region fallthrough
CT: control target
= control target key end

     0   :  { %7 = vsyncpa [#allocation5], 0  ;;  %s149_s12 = smov [#allocation4]   ;;  %s185_s0 = inlined_call_operand.hbm [shape: f32[8,256], index: 0, kind: input, shape index: {}]   ;;  %s186_s1 = inlined_call_operand.vmem [shape: s32[8,1], index: 1, kind: input, shape index: {}]   ;;  %s187_s2 = inlined_call_operand.vmem [shape: f32[8,1], index: 2, kind: output, shape index: {}]  }
   0x1   :  { %s13_s11 = sshll.u32 %s185_s0, 4  ;;  %s15_s13 = sshll.u32 %s149_s12, 4  ;;  %s14_s11 = int_to_ptr.hbm [resolvable:$true] %s13_s11  ;;  %s16_s13 = int_to_ptr.vmem [resolvable:$true] %s15_s13 }
   0x2   :  { %18 = dma.hbm_to_vmem [thread:$0]  %s14_s11, 256, %s16_s13, [#allocation5]  }
   0x3   :  { %147 = dma.done.wait [#allocation5], 256  }
   0x4   :  { %148 = vsyncadd [#allocation5], 4294967040  ;;  %v150_v0 = vmov 0   ;;  %v34_v1 = vld [vmem:[%s186_s1] sm:$0xff]  ;;  %vm29_vm0 = vcmask 7168   ;;  %v151_v2 = vmov 0.0   ;;  %v38_v3 = vlaneseq }
   0x5   :  { %114 = vset.pattern.permute.xlu0 %v150_v0  ;;  %31 = vst.msk [vmem:[#allocation3] sm:$0xff] %vm29_vm0, %v151_v2  ;;  %v32_v6 = vld [vmem:[#allocation4] sm:$0xff]  ;;  %v33_v7 = vld [vmem:[#allocation4 + $0x8] sm:$0xff]  ;;  %vm46_vm5 = vcmp.ge.s32.totalorder %v34_v1, 0  ;;  %vm47_vm6 = vcmp.lt.s32.totalorder %v34_v1, 256 }
   0x6   :  { %42 = vperm.xlu0 %114, %v34_v1   ;;  %30 = vst.msk [vmem:[#allocation2] sm:$0xff] %vm29_vm0, %v151_v2  ;;  %v39_v4 = vand.u32 127, %v38_v3  ;;  %vm48_vm7 = vmand %vm46_vm5, %vm47_vm6 }
   0x8   :  { %v40_v5 = vadd.s32 128, %v39_v4 }
   0xc   :  { %v89_v31 = vld [vmem:[#allocation3] sm:$0xff] }
   0xd   :  { %v76_v44 = vld [vmem:[#allocation2] sm:$0xff] }
  0x78   :  { %v43_v8 = vpop.permute.xlu0 %42 }
  0x79   :  { %vm44_vm1 = vcmp.eq.s32.totalorder %v39_v4, %v43_v8  ;;  %vm45_vm2 = vcmp.eq.s32.totalorder %v40_v5, %v43_v8 }
  0x7a   :  { %v49_v9 = vsel %vm44_vm1, %v32_v6, 0.0  ;;  %v50_v10 = vsel %vm45_vm2, %v33_v7, 0.0 }
  0x7b   :  { %v51_v11 = vadd.f32 %v50_v10, %v49_v9 }
  0x7d   :  { %52 = vadd.xlane.f32.xlu0 %v51_v11 }
  0xf0   :  { %v53_v12 = vpop.xlane.xlu0 %52 }
  0xf1   :  { %v55_v13 = vmul.f32 %v53_v12, %v53_v12  ;;  %v54_v26 = vmul.f32 0.87758255, %v53_v12 }
  0xf3   :  { %v56_v14 = vsub.f32 1.0, %v55_v13 }
  0xf5   :  { %v57_v15 = vmax.f32 %v56_v14, 0.0 }
  0xf7   :  { %115 = vrsqrt.f32 %v57_v15  ;;  %vm65_vm3 = vcmp.eq.f32.partialorder %v57_v15, inf  ;;  %v68_v23 = vand.u32 2147483648, %v57_v15  ;;  %vm67_vm4 = vcmp.eq.f32.partialorder %v57_v15, 0.0 }
  0xfd   :  { %v116_v16 = vpop.eup %115 }
  0xfe   :  { %v59_v17 = vmul.f32 %v116_v16, %v57_v15 }
 0x100   :  { %v60_v18 = vmul.f32 %v116_v16, %v59_v17 }
 0x102   :  { %v61_v19 = vmul.f32 0.5, %v60_v18 }
 0x104   :  { %v62_v20 = vsub.f32 1.5, %v61_v19 }
 0x106   :  { %v63_v21 = vmul.f32 %v116_v16, %v62_v20 }
 0x108   :  { %v64_v22 = vmul.f32 %v63_v21, %v57_v15 }
 0x10a   :  { %v66_v24 = vsel %vm65_vm3, %v57_v15, %v64_v22 }
 0x10b   :  { %v69_v25 = vsel %vm67_vm4, %v68_v23, %v66_v24 }
 0x10c   :  { %v70_v27 = vmul.f32 0.47942555, %v69_v25 }
 0x10e   :  { %v71_v28 = vsub.f32 %v54_v26, %v70_v27 }
 0x110   :  { %v72_v29 = vsel %vm44_vm1, %v71_v28, %v32_v6  ;;  %v73_v30 = vsel %vm45_vm2, %v71_v28, %v33_v7  ;;  %v90_v32 = vmul.f32 26.0, %v71_v28 }
 0x111   :  { %v74_v33 = vmul.f32 26.0, %v72_v29  ;;  %v75_v34 = vmul.f32 26.0, %v73_v30 }
 0x112   :  { %v91_v35 = vsel %vm48_vm7, %v90_v32, 0.0 }
 0x113   :  { %v109_v36 = vadd.f32 -26.0, %v74_v33  ;;  %v110_v37 = vadd.f32 -26.0, %v75_v34  ;;  %v92_v38 = vadd.f32 %v91_v35, %v89_v31 }
 0x115   :  { %93 = vst.msk [vmem:[#allocation3] sm:$0xff] %vm29_vm0, %v92_v38  ;;  %v79_v39 = vmul.f32 1.442695, %v109_v36  ;;  %v81_v40 = vmul.f32 1.442695, %v110_v37 }
 0x117   :  { %117 = vpow2.f32 %v79_v39 }
 0x118   :  { %119 = vpow2.f32 %v81_v40 }
 0x11c   :  { %v101_v51 = vld [vmem:[#allocation3] sm:$0xff] }
 0x11d   :  { %v118_v41 = vpop.eup %117 }
 0x11e   :  { %v120_v42 = vpop.eup %119 }
 0x11f   :  { %v83_v43 = vadd.f32 %v120_v42, %v118_v41 }
 0x121   :  { %84 = vadd.xlane.f32.xlu1 %v83_v43 }
 0x194   :  { %v85_v45 = vpop.xlane.xlu1 %84 }
 0x195   :  { %v86_v46 = vadd.f32 %v85_v45, %v76_v44 }
 0x197   :  { %88 = vst.msk [vmem:[#allocation2] sm:$0xff] %vm29_vm0, %v86_v46 }
 0x19e   :  { %v97_v47 = vld [vmem:[#allocation2] sm:$0xff] }
 0x19f   :  { %121 = vlog2.f32 %v97_v47 }
 0x1a5   :  { %v122_v48 = vpop.eup %121 }
 0x1a6   :  { %v99_v49 = vmul.f32 0.6931472, %v122_v48 }
 0x1a8   :  { %v100_v50 = vadd.f32 26.0, %v99_v49 }
 0x1aa   :  { %v102_v52 = vsub.f32 %v100_v50, %v101_v51 }
 0x1ac   :  { %103 = vst.msk [vmem:[%s187_s2] sm:$0xff] %vm29_vm0, %v102_v52 }
 0x1ad   :  { %108 = vsyncpa [#allocation5], 1 }

</bundles_post_ra>
